<compile_context>
chip_gen: v5e
topology: v5e:2x2
jax: 0.10.0
libtpu: 0.0.40
codegen_flags: <defaults>
</compile_context>

<pallas_src>
import jax
import jax.numpy as jnp
from jax.experimental import pallas as pl
from jax.experimental.pallas import tpu as pltpu

# ---------------- config (small, deterministic, consistent with the module) ----------------
BATCH       = 8
INPUT_DIM   = 1          # BackboneNet input: t reshaped to (-1, 1)
HIDDEN_DIM  = 32
OUTPUT_DIM  = 1          # F_f written into single columns -> output_dim == 1
LAYERS_NUM  = 2          # number of hidden MLPBlocks
UNITNUM     = 1
F_A         = 2.0
F_R         = 0.5
F_TOTAL     = 12 * (UNITNUM + 1)   # 24
NEG_SLOPE   = 0.01                 # nn.LeakyReLU default

_A_COLS = {0: -1.0, 1: 1.0, 3: -1.0, 4: -1.0, 6: 1.0, 7: -1.0, 9: 1.0, 10: 1.0}
_R_OFFS = (2, 5, 8, 11)


def _leaky_relu(x):
    return jnp.where(x > 0, x, NEG_SLOPE * x)


def _round_up(x, m):
    return ((x + m - 1) // m) * m


# ---------------------------------- kernel ----------------------------------
def f_net_kernel(t_ref, vec_ref, mats_ref, wf_ref, wb_ref, f_ref):
    # t tile: (TB, 1).  Packed vectors: rows [w1, b1, b2, b3] of shape (4, H).
    t = t_ref[...]
    vecs = vec_ref[...]
    w1 = vecs[0:1, :]
    b1 = vecs[1:2, :]
    b2 = vecs[2:3, :]
    b3 = vecs[3:4, :]

    # Layer 1: K == 1 matmul is just a broadcast multiply-add -> keep it on the VPU.
    h = _leaky_relu(t * w1 + b1)                                            # (TB, H)

    # Hidden layers on the MXU (weights resident in VMEM across all grid steps).
    h = _leaky_relu(jnp.dot(h, mats_ref[0],
                            preferred_element_type=jnp.float32) + b2)       # (TB, H)
    h = _leaky_relu(jnp.dot(h, mats_ref[1],
                            preferred_element_type=jnp.float32) + b3)       # (TB, H)

    # Folded output: wf already carries +/-F_a * wout in the "a" columns, wb carries
    # the -F_r constants; everything else is zero.  One dot + one add writes F.
    f_ref[...] = jnp.dot(h, wf_ref[...],
                         preferred_element_type=jnp.float32) + wb_ref[...]  # (TB, F_TOTAL)


# --------------------------------- wrapper ----------------------------------
def _pack_params(params):
    """Pack 7 raw parameter arrays into 4 kernel inputs (trace-time, outside kernel)."""
    w1, b1, w2, b2, w3, b3, wout = params
    vecs = jnp.concatenate(
        [w1.reshape(1, HIDDEN_DIM), b1.reshape(1, HIDDEN_DIM),
         b2.reshape(1, HIDDEN_DIM), b3.reshape(1, HIDDEN_DIM)], axis=0)     # (4, H)
    mats = jnp.stack([w2, w3], axis=0)                                      # (2, H, H)

    # Fold final Linear + sign pattern + constants into (H, F_TOTAL) / (1, F_TOTAL).
    wf = jnp.zeros((HIDDEN_DIM, F_TOTAL), jnp.float32)
    for c, s in _A_COLS.items():
        wf = wf.at[:, c].set(s * F_A * wout[:, 0])
    wb = jnp.zeros((1, F_TOTAL), jnp.float32)
    base = 12 * UNITNUM
    for off in _R_OFFS:
        wb = wb.at[0, base + off].set(-F_R)
    return vecs, mats, wf, wb


def f_net_forward(t, params, *, block_rows=512):
    """t: (batch,) or (batch, 1) float32. Returns F of shape (batch, 12*(unitnum+1))."""
    t = jnp.asarray(t).reshape(-1, 1).astype(jnp.float32)
    bs = t.shape[0]
    vecs, mats, wf, wb = _pack_params(params)

    # Batch tiling: tile rows must be a multiple of 8 (sublane); pad batch up to a
    # whole number of tiles and slice the result back afterwards.
    tb = min(block_rows, _round_up(bs, 8))
    padded = pl.cdiv(bs, tb) * tb
    if padded != bs:
        t = jnp.pad(t, ((0, padded - bs), (0, 0)))
    grid = (padded // tb,)

    flops_per_row = (2 * HIDDEN_DIM * HIDDEN_DIM * 2        # two HxH matmuls
                     + 2 * HIDDEN_DIM * F_TOTAL             # folded output matmul
                     + 6 * HIDDEN_DIM)                      # layer-1 + activations
    cost = pl.CostEstimate(
        flops=flops_per_row * padded,
        transcendentals=0,
        bytes_accessed=4 * (padded * (1 + F_TOTAL)
                            + vecs.size + mats.size + wf.size + wb.size),
    )

    out = pl.pallas_call(
        f_net_kernel,
        out_shape=jax.ShapeDtypeStruct((padded, F_TOTAL), jnp.float32),
        grid=grid,
        in_specs=[
            pl.BlockSpec((tb, 1), lambda i: (i, 0)),          # t: tiled over batch
            pl.BlockSpec(vecs.shape, lambda i: (0, 0)),       # params: VMEM-resident
            pl.BlockSpec(mats.shape, lambda i: (0, 0, 0)),
            pl.BlockSpec(wf.shape, lambda i: (0, 0)),
            pl.BlockSpec(wb.shape, lambda i: (0, 0)),
        ],
        out_specs=pl.BlockSpec((tb, F_TOTAL), lambda i: (i, 0)),
        compiler_params=pltpu.CompilerParams(
            dimension_semantics=("parallel",)),               # 2x on v7x's two TCs
        cost_estimate=cost,
    )(t, vecs, mats, wf, wb)

    return out[:bs]


# ------------------------------ params & reference ------------------------------
def init_params(key):
    """Deterministic parameter init matching BackboneNet shapes (stored as (in, out))."""
    ks = jax.random.split(key, 7)
    scale = 0.1
    w1 = scale * jax.random.normal(ks[0], (INPUT_DIM, HIDDEN_DIM), jnp.float32)
    b1 = scale * jax.random.normal(ks[1], (1, HIDDEN_DIM), jnp.float32)
    w2 = scale * jax.random.normal(ks[2], (HIDDEN_DIM, HIDDEN_DIM), jnp.float32)
    b2 = scale * jax.random.normal(ks[3], (1, HIDDEN_DIM), jnp.float32)
    w3 = scale * jax.random.normal(ks[4], (HIDDEN_DIM, HIDDEN_DIM), jnp.float32)
    b3 = scale * jax.random.normal(ks[5], (1, HIDDEN_DIM), jnp.float32)
    wout = scale * jax.random.normal(ks[6], (HIDDEN_DIM, OUTPUT_DIM), jnp.float32)
    return (w1, b1, w2, b2, w3, b3, wout)


def f_net_reference(t, params):
    """Pure-JAX reference mirroring the PyTorch forward."""
    t = jnp.asarray(t).reshape(-1, 1).astype(jnp.float32)
    w1, b1, w2, b2, w3, b3, wout = params
    h = _leaky_relu(t @ w1 + b1)
    h = _leaky_relu(h @ w2 + b2)
    h = _leaky_relu(h @ w3 + b3)
    f_f = h @ wout
    bs = t.shape[0]
    F = jnp.zeros((bs, F_TOTAL), jnp.float32)
    for c, s in _A_COLS.items():
        F = F.at[:, c:c + 1].set(s * F_A * f_f)
    base = 12 * UNITNUM
    for off in _R_OFFS:
        F = F.at[:, base + off].set(-F_R)
    return F


if __name__ == "__main__":
    key = jax.random.PRNGKey(0)
    k_t1, k_t2, k_p = jax.random.split(key, 3)
    params = init_params(k_p)

    # Small-batch case (coords shape (bs, num_states) is unused by the computation).
    t_small = jax.random.uniform(k_t1, (BATCH,), jnp.float32)
    out_small = jax.block_until_ready(f_net_forward(t_small, params))
    ref_small = f_net_reference(t_small, params)
    assert out_small.shape == (BATCH, F_TOTAL)
    assert jnp.allclose(out_small, ref_small, atol=1e-5, rtol=1e-5), "small-batch mismatch"

    # Multi-tile case exercising the batch grid + padding/slicing path.
    t_big = jax.random.uniform(k_t2, (300,), jnp.float32)
    out_big = jax.block_until_ready(f_net_forward(t_big, params, block_rows=64))
    ref_big = f_net_reference(t_big, params)
    assert out_big.shape == (300, F_TOTAL)
    assert jnp.allclose(out_big, ref_big, atol=1e-5, rtol=1e-5), "tiled-batch mismatch"

    print("KERNEL_OK")
</pallas_src>

<mosaic_0001>
module attributes {stable_mosaic.version = 11 : i64} {
  func.func @f_net_kernel(%arg0: i32, %arg1: memref<8x1xf32, #tpu.memory_space<vmem>>, %arg2: memref<4x32xf32, #tpu.memory_space<vmem>>, %arg3: memref<2x32x32xf32, #tpu.memory_space<vmem>>, %arg4: memref<32x24xf32, #tpu.memory_space<vmem>>, %arg5: memref<1x24xf32, #tpu.memory_space<vmem>>, %arg6: memref<8x24xf32, #tpu.memory_space<vmem>>) attributes {dimension_semantics = [#tpu.dimension_semantics<parallel>], iteration_bounds = array<i64: 1>, scalar_prefetch = 0 : i64, scratch_operands = 0 : i64, tpu.core_type = #tpu.core_type<tc>, window_params = [{transform_indices = @transform_0, window_bounds = array<i64: 8, 1>}, {pipeline_mode = #tpu.pipeline_mode<synchronous>, transform_indices = @transform_1, window_bounds = array<i64: 4, 32>}, {pipeline_mode = #tpu.pipeline_mode<synchronous>, transform_indices = @transform_2, window_bounds = array<i64: 2, 32, 32>}, {pipeline_mode = #tpu.pipeline_mode<synchronous>, transform_indices = @transform_3, window_bounds = array<i64: 32, 24>}, {pipeline_mode = #tpu.pipeline_mode<synchronous>, transform_indices = @transform_4, window_bounds = array<i64: 1, 24>}, {transform_indices = @transform_5, window_bounds = array<i64: 8, 24>}]} {
    %c0 = arith.constant 0 : index
    %c0_0 = arith.constant 0 : index
    %0 = vector.load %arg1[%c0, %c0_0] : memref<8x1xf32, #tpu.memory_space<vmem>>, vector<8x1xf32>
    %c0_1 = arith.constant 0 : index
    %c0_2 = arith.constant 0 : index
    %1 = vector.load %arg2[%c0_1, %c0_2] : memref<4x32xf32, #tpu.memory_space<vmem>>, vector<4x32xf32>
    %2 = vector.extract_strided_slice %1 {offsets = [0, 0], sizes = [1, 32], strides = [1, 1]} : vector<4x32xf32> to vector<1x32xf32>
    %3 = vector.extract_strided_slice %1 {offsets = [1, 0], sizes = [1, 32], strides = [1, 1]} : vector<4x32xf32> to vector<1x32xf32>
    %4 = vector.extract_strided_slice %1 {offsets = [2, 0], sizes = [1, 32], strides = [1, 1]} : vector<4x32xf32> to vector<1x32xf32>
    %5 = vector.extract_strided_slice %1 {offsets = [3, 0], sizes = [1, 32], strides = [1, 1]} : vector<4x32xf32> to vector<1x32xf32>
    %6 = vector.broadcast %0 : vector<8x1xf32> to vector<8x32xf32>
    %7 = vector.broadcast %2 : vector<1x32xf32> to vector<8x32xf32>
    %8 = arith.mulf %6, %7 : vector<8x32xf32>
    %9 = vector.broadcast %3 : vector<1x32xf32> to vector<8x32xf32>
    %10 = arith.addf %8, %9 : vector<8x32xf32>
    %cst = arith.constant 0.000000e+00 : f32
    %11 = vector.broadcast %cst : f32 to vector<8x32xf32>
    %12 = arith.cmpf ogt, %10, %11 : vector<8x32xf32>
    %cst_3 = arith.constant 0.00999999977 : f32
    %13 = vector.broadcast %cst_3 : f32 to vector<8x32xf32>
    %14 = arith.mulf %13, %10 : vector<8x32xf32>
    %15 = arith.select %12, %10, %14 : vector<8x32xi1>, vector<8x32xf32>
    %c0_4 = arith.constant 0 : index
    %c0_5 = arith.constant 0 : index
    %c0_6 = arith.constant 0 : index
    %16 = vector.load %arg3[%c0_4, %c0_5, %c0_6] : memref<2x32x32xf32, #tpu.memory_space<vmem>>, vector<1x32x32xf32>
    %17 = vector.shape_cast %16 : vector<1x32x32xf32> to vector<32x32xf32>
    %cst_7 = arith.constant dense<0.000000e+00> : vector<8x32xf32>
    %18 = tpu.matmul %15, %17, %cst_7 {dimension_numbers = #tpu.dot_dimension_numbers<[1], [0], [0], [1], [0, 0, 1, 1], [], []>} : vector<8x32xf32>, vector<32x32xf32>, vector<8x32xf32> -> vector<8x32xf32>
    %19 = vector.broadcast %4 : vector<1x32xf32> to vector<8x32xf32>
    %20 = arith.addf %18, %19 : vector<8x32xf32>
    %cst_8 = arith.constant 0.000000e+00 : f32
    %21 = vector.broadcast %cst_8 : f32 to vector<8x32xf32>
    %22 = arith.cmpf ogt, %20, %21 : vector<8x32xf32>
    %cst_9 = arith.constant 0.00999999977 : f32
    %23 = vector.broadcast %cst_9 : f32 to vector<8x32xf32>
    %24 = arith.mulf %23, %20 : vector<8x32xf32>
    %25 = arith.select %22, %20, %24 : vector<8x32xi1>, vector<8x32xf32>
    %c1 = arith.constant 1 : index
    %c0_10 = arith.constant 0 : index
    %c0_11 = arith.constant 0 : index
    %26 = vector.load %arg3[%c1, %c0_10, %c0_11] : memref<2x32x32xf32, #tpu.memory_space<vmem>>, vector<1x32x32xf32>
    %27 = vector.shape_cast %26 : vector<1x32x32xf32> to vector<32x32xf32>
    %cst_12 = arith.constant dense<0.000000e+00> : vector<8x32xf32>
    %28 = tpu.matmul %25, %27, %cst_12 {dimension_numbers = #tpu.dot_dimension_numbers<[1], [0], [0], [1], [0, 0, 1, 1], [], []>} : vector<8x32xf32>, vector<32x32xf32>, vector<8x32xf32> -> vector<8x32xf32>
    %29 = vector.broadcast %5 : vector<1x32xf32> to vector<8x32xf32>
    %30 = arith.addf %28, %29 : vector<8x32xf32>
    %cst_13 = arith.constant 0.000000e+00 : f32
    %31 = vector.broadcast %cst_13 : f32 to vector<8x32xf32>
    %32 = arith.cmpf ogt, %30, %31 : vector<8x32xf32>
    %cst_14 = arith.constant 0.00999999977 : f32
    %33 = vector.broadcast %cst_14 : f32 to vector<8x32xf32>
    %34 = arith.mulf %33, %30 : vector<8x32xf32>
    %35 = arith.select %32, %30, %34 : vector<8x32xi1>, vector<8x32xf32>
    %c0_15 = arith.constant 0 : index
    %c0_16 = arith.constant 0 : index
    %36 = vector.load %arg4[%c0_15, %c0_16] : memref<32x24xf32, #tpu.memory_space<vmem>>, vector<32x24xf32>
    %cst_17 = arith.constant dense<0.000000e+00> : vector<8x24xf32>
    %37 = tpu.matmul %35, %36, %cst_17 {dimension_numbers = #tpu.dot_dimension_numbers<[1], [0], [0], [1], [0, 0, 1, 1], [], []>} : vector<8x32xf32>, vector<32x24xf32>, vector<8x24xf32> -> vector<8x24xf32>
    %c0_18 = arith.constant 0 : index
    %c0_19 = arith.constant 0 : index
    %38 = vector.load %arg5[%c0_18, %c0_19] : memref<1x24xf32, #tpu.memory_space<vmem>>, vector<1x24xf32>
    %39 = vector.broadcast %38 : vector<1x24xf32> to vector<8x24xf32>
    %40 = arith.addf %37, %39 : vector<8x24xf32>
    %c0_20 = arith.constant 0 : index
    %c0_21 = arith.constant 0 : index
    %41 = vector.load %arg6[%c0_20, %c0_21] : memref<8x24xf32, #tpu.memory_space<vmem>>, vector<8x24xf32>
    tpu.vector_store %arg6[%c0_20, %c0_21], %40 {strides = array<i32>} : memref<8x24xf32, #tpu.memory_space<vmem>>, vector<8x24xf32>,
    return
  }
  func.func @transform_0(%arg0: i32) -> (i32, i32) {
    %c0_i32 = arith.constant 0 : i32
    %c0_i32_0 = arith.constant 0 : i32
    return %arg0, %c0_i32 : i32, i32
  }
  func.func @transform_1(%arg0: i32) -> (i32, i32) {
    %c0_i32 = arith.constant 0 : i32
    %c0_i32_0 = arith.constant 0 : i32
    %c0_i32_1 = arith.constant 0 : i32
    return %c0_i32, %c0_i32_0 : i32, i32
  }
  func.func @transform_2(%arg0: i32) -> (i32, i32, i32) {
    %c0_i32 = arith.constant 0 : i32
    %c0_i32_0 = arith.constant 0 : i32
    %c0_i32_1 = arith.constant 0 : i32
    %c0_i32_2 = arith.constant 0 : i32
    return %c0_i32, %c0_i32_0, %c0_i32_1 : i32, i32, i32
  }
  func.func @transform_3(%arg0: i32) -> (i32, i32) {
    %c0_i32 = arith.constant 0 : i32
    %c0_i32_0 = arith.constant 0 : i32
    %c0_i32_1 = arith.constant 0 : i32
    return %c0_i32, %c0_i32_0 : i32, i32
  }
  func.func @transform_4(%arg0: i32) -> (i32, i32) {
    %c0_i32 = arith.constant 0 : i32
    %c0_i32_0 = arith.constant 0 : i32
    %c0_i32_1 = arith.constant 0 : i32
    return %c0_i32, %c0_i32_0 : i32, i32
  }
  func.func @transform_5(%arg0: i32) -> (i32, i32) {
    %c0_i32 = arith.constant 0 : i32
    %c0_i32_0 = arith.constant 0 : i32
    return %arg0, %c0_i32 : i32, i32
  }
}

</mosaic_0001>

<bundles_post_ra>
// kernel: tpu_custom_call.1
= control target key start
LH: loop header
LB: loop body
LE: loop exit
PB: predicated region body
PF: predicated region fallthrough
CT: control target
= control target key end

     0   :  { %10 = vsyncpa [#allocation3], 0  ;;  %s311_s0 = inlined_call_operand.vmem [shape: f32[8,1], index: 0, kind: input, shape index: {}]   ;;  %s312_s1 = inlined_call_operand.hbm [shape: f32[4,32], index: 1, kind: input, shape index: {}]   ;;  %s313_s2 = inlined_call_operand.vmem [shape: f32[2,32,32], index: 2, kind: input, shape index: {}]   ;;  %s314_s3 = inlined_call_operand.vmem [shape: f32[32,24], index: 3, kind: input, shape index: {}]   ;;  %s315_s4 = inlined_call_operand.vmem [shape: f32[1,24], index: 4, kind: input, shape index: {}]   ;;  %s316_s5 = inlined_call_operand.hbm [shape: f32[8,24], index: 5, kind: output, shape index: {}]  }
   0x1   :  { %11 = vsyncpa [#allocation4], 0  ;;  %s19_s20 = sshll.u32 %s312_s1, 4  ;;  %s227_s21 = smov [#allocation2]   ;;  %s20_s20 = int_to_ptr.hbm [resolvable:$true] %s19_s20 }
   0x2   :  { %s21_s22 = sshll.u32 %s227_s21, 4  ;;  %s22_s22 = int_to_ptr.vmem [resolvable:$true] %s21_s22 }
   0x3   :  { %24 = dma.hbm_to_vmem [thread:$0]  %s20_s20, 64, %s22_s22, [#allocation3]  }
   0x4   :  { %223 = dma.done.wait [#allocation3], 64  }
   0x5   :  { %224 = vsyncadd [#allocation3], 4294967232  ;;  %v228_v0 = vmov 0   ;;  %v35_v1 = vld [vmem:[%s311_s0] sm:$0xff]  ;;  %v52_v2 = vld [vmem:[%s313_s2 + $0x18] sm:$0xff]  ;;  %vm54_vm1 = vcmask 261120  }
   0x6   :  { %173 = vset.pattern.permute.xlu0 %v228_v0  ;;  %70 = vmatpush.msra.mxu0 %v52_v2  ;;  %v51_v3 = vld [vmem:[%s313_s2 + $0x10] sm:$0xff]  ;;  %v50_v4 = vld [vmem:[%s313_s2 + $0x8] sm:$0xff]  ;;  %v49_v5 = vld [vmem:[%s313_s2] sm:$0xff]  ;;  %s229_s23 = smov [#allocation5]   ;;  %s153_s1 = sshll.u32 %s316_s5, 4  ;;  %vm144_vm4 = vcmask 195584   ;;  %s154_s1 = int_to_ptr.hbm [resolvable:$true] %s153_s1 }
   0x7   :  { %39 = vperm.xlu0 %173, %v35_v1   ;;  %v167_v6 = vld [vmem:[%s313_s2 + $0x38] sm:$0xff]  ;;  %v36_v7 = vld [vmem:[#allocation2] sm:$0xf]  ;;  %v166_v15 = vld [vmem:[%s313_s2 + $0x30] sm:$0xff]  ;;  %s151_s24 = sshll.u32 %s229_s23, 4  ;;  %s152_s24 = int_to_ptr.vmem [resolvable:$true] %s151_s24 }
   0x8   :  { %71 = vmatpush.msra.mxu0 %v51_v3  ;;  %102 = vmatpush.msra.mxu1 %v167_v6  ;;  %v42_v8 = vperm.slane %v36_v7, 0  ;;  %v44_v9 = vperm.slane %v36_v7, 1  ;;  %v165_v16 = vld [vmem:[%s313_s2 + $0x28] sm:$0xff]  ;;  %v164_v17 = vld [vmem:[%s313_s2 + $0x20] sm:$0xff]  ;;  %v116_v18 = vld [vmem:[%s314_s3 + $0x18] sm:$0xff]  ;;  %v53_v19 = vperm.slane %v36_v7, 2 }
   0x9   :  { %136 = vmatpush.msra.mxu2 %v116_v18  ;;  %v115_v24 = vld [vmem:[%s314_s3 + $0x10] sm:$0xff]  ;;  %v114_v25 = vld [vmem:[%s314_s3 + $0x8] sm:$0xff]  ;;  %v113_v26 = vld [vmem:[%s314_s3] sm:$0xff]  ;;  %v86_v27 = vperm.slane %v36_v7, 3 }
   0xa   :  { %72 = vmatpush.msra.mxu0 %v50_v4  ;;  %103 = vmatpush.msra.mxu1 %v166_v15  ;;  %v174_v32 = vld [vmem:[%s315_s4] ss:$0 sm:$0xff] }
   0xb   :  { %137 = vmatpush.msra.mxu2 %v115_v24 }
   0xc   :  { %73 = vmatpush.msra.mxu0 %v49_v5  ;;  %104 = vmatpush.msra.mxu1 %v165_v16 }
   0xd   :  { %138 = vmatpush.msra.mxu2 %v114_v25 }
   0xe   :  { %105 = vmatpush.msra.mxu1 %v164_v17 }
   0xf   :  { %139 = vmatpush.msra.mxu2 %v113_v26 }
  0x79   :  { %v40_v10 = vpop.permute.xlu0 %39 }
  0x7a   :  { %v43_v11 = vmul.f32 %v42_v8, %v40_v10 }
  0x7c   :  { %v45_v12 = vadd.f32 %v44_v9, %v43_v11 }
  0x7e   :  { %vm46_vm0 = vcmp.gt.f32.partialorder %v45_v12, 0.0  ;;  %v47_v13 = vmul.f32 0.01, %v45_v12 }
  0x80   :  { %v48_v14 = vsel %vm46_vm0, %v45_v12, %v47_v13 }
  0x81   :  { %163 = vmatmul.msk.f32.vlgmr.msra.gmra.mxu0 %vm54_vm1, %v48_v14 }
  0xfe   :  { %v75_v20 = vpop.f32.mrf.mxu0 }
  0xff   :  { %v76_v21 = vadd.f32 %v75_v20, %v53_v19 }
 0x101   :  { %v79_v22 = vmul.f32 0.01, %v76_v21  ;;  %vm78_vm2 = vcmp.gt.f32.partialorder %v76_v21, 0.0 }
 0x103   :  { %v80_v23 = vsel %vm78_vm2, %v76_v21, %v79_v22 }
 0x104   :  { %168 = vmatmul.msk.f32.vlgmr.msra.gmra.mxu1 %vm54_vm1, %v80_v23 }
 0x181   :  { %v107_v28 = vpop.f32.mrf.mxu1 }
 0x182   :  { %v108_v29 = vadd.f32 %v107_v28, %v86_v27 }
 0x184   :  { %v111_v30 = vmul.f32 0.01, %v108_v29  ;;  %vm110_vm3 = vcmp.gt.f32.partialorder %v108_v29, 0.0 }
 0x186   :  { %v112_v31 = vsel %vm110_vm3, %v108_v29, %v111_v30 }
 0x187   :  { %169 = vmatmul.msk.f32.vlgmr.msra.gmra.mxu2 %vm54_vm1, %v112_v31 }
 0x20a   :  { %v141_v33 = vpop.f32.mrf.mxu2 }
 0x20b   :  { %v142_v34 = vadd.f32 %v174_v32, %v141_v33 }
 0x20d   :  { %145 = vst.msk [vmem:[#allocation5] sm:$0xff] %vm144_vm4, %v142_v34 }
 0x20e   :  { %156 = dma.vmem_to_hbm [thread:$0]  %s152_s24, 128, %s154_s1, [#allocation4]  }
 0x20f   :  { %225 = dma.done.wait [#allocation4], 128  }
 0x210   :  { %226 = vsyncadd [#allocation4], 4294967168 }
 0x211   :  { %161 = vsyncpa [#allocation3], 1 }
 0x212   :  { %162 = vsyncpa [#allocation4], 1 }

</bundles_post_ra>
